<compile_context>
chip_gen: v7x
topology: tpu7x:2x2x1
jax: 0.10.0
libtpu: 0.0.40
codegen_flags: <defaults>
</compile_context>

<pallas_src>
import functools

import jax
import jax.numpy as jnp
from jax.experimental import pallas as pl
from jax.experimental.pallas import tpu as pltpu

_MAX_TM = 256     # output-row tile cap (sublane axis)
_MAX_TN = 512     # output-col tile cap (lane axis)
_MAX_TK = 2048    # contraction tile cap


def _pick_row_tile(dim, max_tile=_MAX_TM):
    """(tile, padded_dim) for a sublane-axis dim (8-aligned; full dim allowed)."""
    if dim <= max_tile:
        return dim, dim
    t = (max_tile // 8) * 8
    while t >= 8:
        if dim % t == 0:
            return t, dim
        t -= 8
    t = (max_tile // 8) * 8
    return t, ((dim + t - 1) // t) * t


def _pick_lane_tile(dim, max_tile):
    """(tile, padded_dim) for a lane-axis dim (always 128-aligned)."""
    dp = ((dim + 127) // 128) * 128
    if dp <= max_tile:
        return dp, dp
    t = (max_tile // 128) * 128
    while t >= 128:
        if dp % t == 0:
            return t, dp
        t -= 128
    return 128, dp


# ----------------------------------------------------------------------------
# Fused conv-as-matmul kernel: (A @ B) * scale + bias [+ residual] [ReLU]
# ----------------------------------------------------------------------------

def _fused_mm_kernel(a_ref, b_ref, s_ref, c_ref, o_ref, acc_ref, *, relu):
    @pl.when(pl.program_id(2) == 0)
    def _init():
        acc_ref[...] = jnp.zeros_like(acc_ref)

    acc_ref[...] += jnp.dot(a_ref[...], b_ref[...],
                            preferred_element_type=jnp.float32)

    @pl.when(pl.program_id(2) == pl.num_programs(2) - 1)
    def _epilogue():
        y = acc_ref[...] * s_ref[...] + c_ref[...]
        if relu:
            y = jnp.maximum(y, 0.0)
        o_ref[...] = y.astype(o_ref.dtype)


def _fused_mm_res_kernel(a_ref, b_ref, s_ref, c_ref, r_ref, o_ref, acc_ref, *,
                         relu):
    @pl.when(pl.program_id(2) == 0)
    def _init():
        acc_ref[...] = jnp.zeros_like(acc_ref)

    acc_ref[...] += jnp.dot(a_ref[...], b_ref[...],
                            preferred_element_type=jnp.float32)

    @pl.when(pl.program_id(2) == pl.num_programs(2) - 1)
    def _epilogue():
        y = acc_ref[...] * s_ref[...] + c_ref[...] + r_ref[...].astype(jnp.float32)
        if relu:
            y = jnp.maximum(y, 0.0)
        o_ref[...] = y.astype(o_ref.dtype)


def _fused_matmul_impl(a, b, scale, bias, residual, relu):
    """out = epilogue(a @ b), epilogue = (acc * scale + bias [+ residual])[ReLU]."""
    M, K = a.shape
    _, N = b.shape
    tm, Mp = _pick_row_tile(M, _MAX_TM)
    tn, Np = _pick_lane_tile(N, _MAX_TN)
    tk, Kp = _pick_lane_tile(K, _MAX_TK)

    if Mp != M:
        a = jnp.pad(a, ((0, Mp - M), (0, 0)))
        if residual is not None:
            residual = jnp.pad(residual, ((0, Mp - M), (0, 0)))
    if Kp != K:                       # only the 7x7 stem (K=147) hits this
        a = jnp.pad(a, ((0, 0), (0, Kp - K)))
        b = jnp.pad(b, ((0, Kp - K), (0, 0)))
    if Np != N:
        b = jnp.pad(b, ((0, 0), (0, Np - N)))
        scale = jnp.pad(scale, ((0, 0), (0, Np - N)))
        bias = jnp.pad(bias, ((0, 0), (0, Np - N)))
        if residual is not None:
            residual = jnp.pad(residual, ((0, 0), (0, Np - N)))

    a = a.astype(jnp.bfloat16)
    b = b.astype(jnp.bfloat16)

    in_specs = [pl.BlockSpec((tm, tk), lambda i, j, k: (i, k)),
                pl.BlockSpec((tk, tn), lambda i, j, k: (k, j)),
                pl.BlockSpec((1, tn), lambda i, j, k: (0, j)),
                pl.BlockSpec((1, tn), lambda i, j, k: (0, j))]
    operands = [a, b, scale, bias]
    if residual is None:
        kernel = functools.partial(_fused_mm_kernel, relu=relu)
    else:
        in_specs.append(pl.BlockSpec((tm, tn), lambda i, j, k: (i, j)))
        operands.append(residual)
        kernel = functools.partial(_fused_mm_res_kernel, relu=relu)

    out = pl.pallas_call(
        kernel,
        out_shape=jax.ShapeDtypeStruct((Mp, Np), jnp.float32),
        grid_spec=pltpu.PrefetchScalarGridSpec(
            num_scalar_prefetch=0,
            grid=(Mp // tm, Np // tn, Kp // tk),
            in_specs=in_specs,
            out_specs=pl.BlockSpec((tm, tn), lambda i, j, k: (i, j)),
            scratch_shapes=[pltpu.VMEM((tm, tn), jnp.float32)]),
        compiler_params=pltpu.CompilerParams(
            dimension_semantics=("parallel", "parallel", "arbitrary")),
    )(*operands)

    if Mp != M or Np != N:
        out = out[:M, :N]
    return out


fused_matmul = jax.jit(_fused_matmul_impl, static_argnames=("relu",))


# ----------------------------------------------------------------------------
# Row-tiled maxpool reduction and (tiny) global average pool
# ----------------------------------------------------------------------------

def _max_reduce_kernel(x_ref, o_ref):
    o_ref[...] = jnp.max(x_ref[...], axis=0)


def _max_reduce_impl(x):
    K, M, C = x.shape
    tm, Mp = _pick_row_tile(M, 512)
    if Mp != M:
        x = jnp.pad(x, ((0, 0), (0, Mp - M), (0, 0)))
    out = pl.pallas_call(
        _max_reduce_kernel,
        out_shape=jax.ShapeDtypeStruct((Mp, C), x.dtype),
        grid=(Mp // tm,),
        in_specs=[pl.BlockSpec((K, tm, C), lambda i: (0, i, 0))],
        out_specs=pl.BlockSpec((tm, C), lambda i: (i, 0)),
        compiler_params=pltpu.CompilerParams(
            dimension_semantics=("parallel",)),
    )(x)
    return out[:M] if Mp != M else out


max_reduce_pallas = jax.jit(_max_reduce_impl)


def _mean_reduce_kernel(x_ref, o_ref):
    o_ref[...] = jnp.mean(x_ref[...], axis=1)


def _mean_reduce_impl(x):
    # Global average pool input is tiny (N, H*W, 512); a single block is fine.
    N, HW, C = x.shape
    return pl.pallas_call(
        _mean_reduce_kernel,
        out_shape=jax.ShapeDtypeStruct((N, C), x.dtype),
        grid=(1,),
        in_specs=[pl.BlockSpec((N, HW, C), lambda i: (0, 0, 0))],
        out_specs=pl.BlockSpec((N, C), lambda i: (0, 0)),
    )(x)


mean_reduce_pallas = jax.jit(_mean_reduce_impl)


# ----------------------------------------------------------------------------
# ResNet-34 building blocks (glue in plain JAX, hot paths in fused Pallas)
# ----------------------------------------------------------------------------

def _im2col(x, kh, kw, stride, pad):
    # x: (N, H, W, C) -> (N*Ho*Wo, kh*kw*C)
    N, H, W, C = x.shape
    xp = jnp.pad(x, ((0, 0), (pad, pad), (pad, pad), (0, 0)))
    Ho = (H + 2 * pad - kh) // stride + 1
    Wo = (W + 2 * pad - kw) // stride + 1
    cols = [xp[:, i:i + stride * Ho:stride, j:j + stride * Wo:stride, :]
            for i in range(kh) for j in range(kw)]
    patches = cols[0] if len(cols) == 1 else jnp.concatenate(cols, axis=-1)
    return patches.reshape(N * Ho * Wo, kh * kw * C), Ho, Wo


def conv_bn(x, p, kh, kw, stride, pad, relu, residual=None):
    # x: (N,H,W,Cin_pad) f32 ; p['w']: (kh*kw*Cin_pad, Cout_pad) bf16
    n = x.shape[0]
    patches, Ho, Wo = _im2col(x.astype(jnp.bfloat16), kh, kw, stride, pad)
    cout = p["w"].shape[1]
    res2d = None if residual is None else residual.reshape(n * Ho * Wo, cout)
    out = fused_matmul(patches, p["w"], p["scale"], p["bias"], res2d, relu=relu)
    return out.reshape(n, Ho, Wo, cout)


def maxpool_3x3_s2(x):
    N, H, W, C = x.shape
    k, stride, pad = 3, 2, 1
    xp = jnp.pad(x, ((0, 0), (pad, pad), (pad, pad), (0, 0)),
                 constant_values=-jnp.inf)
    Ho = (H + 2 * pad - k) // stride + 1
    Wo = (W + 2 * pad - k) // stride + 1
    slices = [xp[:, i:i + stride * Ho:stride, j:j + stride * Wo:stride, :]
              for i in range(k) for j in range(k)]
    stacked = jnp.stack(slices, axis=0).reshape(k * k, N * Ho * Wo, C)
    return max_reduce_pallas(stacked).reshape(N, Ho, Wo, C)


def basic_block(x, blk, stride):
    if "down" in blk:
        identity = conv_bn(x, blk["down"], 1, 1, stride, 0, relu=False)
    else:
        identity = x
    out = conv_bn(x, blk["c1"], 3, 3, stride, 1, relu=True)
    # conv2 + BN + residual-add + ReLU are all fused into one kernel epilogue.
    out = conv_bn(out, blk["c2"], 3, 3, 1, 1, relu=True, residual=identity)
    return out


RESNET34_CFG = [(64, 3, 1), (128, 4, 2), (256, 6, 2), (512, 3, 2)]


def resnet34_features(x, params):
    x = conv_bn(x, params["stem"], 7, 7, 2, 3, relu=True)
    x = maxpool_3x3_s2(x)
    for (out_c, nblocks, stride), blocks in zip(RESNET34_CFG, params["layers"]):
        for bi, blk in enumerate(blocks):
            x = basic_block(x, blk, stride if bi == 0 else 1)
    N, H, W, C = x.shape
    return mean_reduce_pallas(x.reshape(N, H * W, C))   # (N, 512)


def dual_model_forward(img, edge_img, params1, params2, fc, num_classes):
    # img / edge_img: NCHW (PyTorch convention)
    x1 = jnp.transpose(img, (0, 2, 3, 1))
    x2 = jnp.transpose(edge_img, (0, 2, 3, 1))
    f1 = resnet34_features(x1, params1)
    f2 = resnet34_features(x2, params2)
    feat = jnp.concatenate([f1, f2], axis=1)                   # (N, 1024)
    # fc with bias fused into the matmul epilogue (scale == 1).
    out = fused_matmul(feat, fc["w"], fc["scale"], fc["bias"], None, relu=False)
    return out[:, :num_classes]


# ----------------------------------------------------------------------------
# Deterministic parameter init (synthetic; no checkpoint loading).
# Conv + BN are folded into (w, scale, bias), channel-padded to multiples of
# 128 (lane-dense) and pre-cast to bf16 at init.
# ----------------------------------------------------------------------------

def _cpad(c):
    return ((c + 127) // 128) * 128


def _fold_conv_bn(key, kh, kw, cin, cout, cin_p, cout_p):
    w = 0.05 * jax.random.normal(key, (kh, kw, cin, cout), jnp.float32)
    gamma = jnp.ones((cout,), jnp.float32)
    beta = jnp.zeros((cout,), jnp.float32)
    mean = jnp.zeros((cout,), jnp.float32)
    var = jnp.ones((cout,), jnp.float32)
    scale = gamma / jnp.sqrt(var + 1e-5)
    bias = beta - mean * scale
    wp = jnp.zeros((kh, kw, cin_p, cout_p), jnp.float32)
    wp = wp.at[:, :, :cin, :cout].set(w)
    # Padded output channels must stay exactly zero: scale=1, bias=0 there.
    sp = jnp.ones((cout_p,), jnp.float32).at[:cout].set(scale)
    bp = jnp.zeros((cout_p,), jnp.float32).at[:cout].set(bias)
    return {"w": wp.reshape(kh * kw * cin_p, cout_p).astype(jnp.bfloat16),
            "scale": sp[None, :], "bias": bp[None, :]}


def init_backbone(key):
    keys = iter(jax.random.split(key, 64))
    params = {"stem": _fold_conv_bn(next(keys), 7, 7, 3, 64, 3, _cpad(64))}
    layers = []
    in_c = 64
    for out_c, nblocks, stride in RESNET34_CFG:
        blocks = []
        for bi in range(nblocks):
            s = stride if bi == 0 else 1
            blk = {"c1": _fold_conv_bn(next(keys), 3, 3, in_c, out_c,
                                       _cpad(in_c), _cpad(out_c)),
                   "c2": _fold_conv_bn(next(keys), 3, 3, out_c, out_c,
                                       _cpad(out_c), _cpad(out_c))}
            if s != 1 or in_c != out_c:
                blk["down"] = _fold_conv_bn(next(keys), 1, 1, in_c, out_c,
                                            _cpad(in_c), _cpad(out_c))
            blocks.append(blk)
            in_c = out_c
        layers.append(blocks)
    params["layers"] = layers
    return params


def init_fc(key_w, key_b, in_dim, num_classes):
    ncp = _cpad(num_classes)
    w = 0.02 * jax.random.normal(key_w, (in_dim, num_classes), jnp.float32)
    b = 0.01 * jax.random.normal(key_b, (num_classes,), jnp.float32)
    wp = jnp.zeros((in_dim, ncp), jnp.float32).at[:, :num_classes].set(w)
    bp = jnp.zeros((ncp,), jnp.float32).at[:num_classes].set(b)
    return {"w": wp.astype(jnp.bfloat16),
            "scale": jnp.ones((1, ncp), jnp.float32),
            "bias": bp[None, :]}


if __name__ == "__main__":
    num_classes = 1000
    key = jax.random.PRNGKey(0)
    k_img, k_edge, k_b1, k_b2, k_fcw, k_fcb = jax.random.split(key, 6)

    # Small shapes consistent with the module: NCHW RGB images.
    img = jax.random.normal(k_img, (2, 3, 32, 32), jnp.float32)
    edge_img = jax.random.normal(k_edge, (2, 3, 32, 32), jnp.float32)

    params1 = init_backbone(k_b1)
    params2 = init_backbone(k_b2)
    fc = init_fc(k_fcw, k_fcb, 512 * 2, num_classes)

    out = dual_model_forward(img, edge_img, params1, params2, fc, num_classes)
    out = jax.block_until_ready(out)

    assert out.shape == (2, num_classes), out.shape
    assert bool(jnp.all(jnp.isfinite(out)))
    print("KERNEL_OK")
</pallas_src>

<mosaic_0001>
module attributes {stable_mosaic.version = 11 : i64} {
  func.func @_fused_mm_kernel(%arg0: i32, %arg1: i32, %arg2: i32, %arg3: memref<256x256xbf16, #tpu.memory_space<vmem>>, %arg4: memref<256x128xbf16, #tpu.memory_space<vmem>>, %arg5: memref<1x128xf32, #tpu.memory_space<vmem>>, %arg6: memref<1x128xf32, #tpu.memory_space<vmem>>, %arg7: memref<256x128xf32, #tpu.memory_space<vmem>>, %arg8: memref<256x128xf32, #tpu.memory_space<vmem>>) attributes {dimension_semantics = [#tpu.dimension_semantics<parallel>, #tpu.dimension_semantics<parallel>, #tpu.dimension_semantics<arbitrary>], iteration_bounds = array<i64: 2, 1, 1>, scalar_prefetch = 0 : i64, scratch_operands = 1 : i64, tpu.core_type = #tpu.core_type<tc>, window_params = [{transform_indices = @transform_0, window_bounds = array<i64: 256, 256>}, {transform_indices = @transform_1, window_bounds = array<i64: 256, 128>}, {transform_indices = @transform_2, window_bounds = array<i64: 1, 128>}, {transform_indices = @transform_3, window_bounds = array<i64: 1, 128>}, {transform_indices = @transform_4, window_bounds = array<i64: 256, 128>}]} {
    %c0_i32 = arith.constant 0 : i32
    %0 = arith.cmpi eq, %arg2, %c0_i32 : i32
    %1 = arith.extui %0 : i1 to i32
    %c0_i32_0 = arith.constant 0 : i32
    %2 = arith.cmpi ne, %1, %c0_i32_0 : i32
    scf.if %2 {
      %cst_10 = arith.constant 0.000000e+00 : f32
      %12 = vector.broadcast %cst_10 : f32 to vector<256x128xf32>
      %c0_11 = arith.constant 0 : index
      %c0_12 = arith.constant 0 : index
      %13 = vector.load %arg8[%c0_11, %c0_12] : memref<256x128xf32, #tpu.memory_space<vmem>>, vector<256x128xf32>
      tpu.vector_store %arg8[%c0_11, %c0_12], %12 {strides = array<i32>} : memref<256x128xf32, #tpu.memory_space<vmem>>, vector<256x128xf32>,
    } else {
    }
    %c0 = arith.constant 0 : index
    %c0_1 = arith.constant 0 : index
    %3 = vector.load %arg8[%c0, %c0_1] : memref<256x128xf32, #tpu.memory_space<vmem>>, vector<256x128xf32>
    %c0_2 = arith.constant 0 : index
    %c0_3 = arith.constant 0 : index
    %4 = vector.load %arg3[%c0_2, %c0_3] : memref<256x256xbf16, #tpu.memory_space<vmem>>, vector<256x256xbf16>
    %c0_4 = arith.constant 0 : index
    %c0_5 = arith.constant 0 : index
    %5 = vector.load %arg4[%c0_4, %c0_5] : memref<256x128xbf16, #tpu.memory_space<vmem>>, vector<256x128xbf16>
    %cst = arith.constant dense<0.000000e+00> : vector<256x128xf32>
    %6 = tpu.matmul %4, %5, %cst {dimension_numbers = #tpu.dot_dimension_numbers<[1], [0], [0], [1], [0, 0, 1, 1], [], []>} : vector<256x256xbf16>, vector<256x128xbf16>, vector<256x128xf32> -> vector<256x128xf32>
    %7 = arith.addf %3, %6 : vector<256x128xf32>
    %c0_6 = arith.constant 0 : index
    %c0_7 = arith.constant 0 : index
    %8 = vector.load %arg8[%c0_6, %c0_7] : memref<256x128xf32, #tpu.memory_space<vmem>>, vector<256x128xf32>
    tpu.vector_store %arg8[%c0_6, %c0_7], %7 {strides = array<i32>} : memref<256x128xf32, #tpu.memory_space<vmem>>, vector<256x128xf32>,
    %c0_i32_8 = arith.constant 0 : i32
    %9 = arith.cmpi eq, %arg2, %c0_i32_8 : i32
    %10 = arith.extui %9 : i1 to i32
    %c0_i32_9 = arith.constant 0 : i32
    %11 = arith.cmpi ne, %10, %c0_i32_9 : i32
    scf.if %11 {
      %c0_10 = arith.constant 0 : index
      %c0_11 = arith.constant 0 : index
      %12 = vector.load %arg8[%c0_10, %c0_11] : memref<256x128xf32, #tpu.memory_space<vmem>>, vector<256x128xf32>
      %c0_12 = arith.constant 0 : index
      %c0_13 = arith.constant 0 : index
      %13 = vector.load %arg5[%c0_12, %c0_13] : memref<1x128xf32, #tpu.memory_space<vmem>>, vector<1x128xf32>
      %14 = vector.broadcast %13 : vector<1x128xf32> to vector<256x128xf32>
      %15 = arith.mulf %12, %14 : vector<256x128xf32>
      %c0_14 = arith.constant 0 : index
      %c0_15 = arith.constant 0 : index
      %16 = vector.load %arg6[%c0_14, %c0_15] : memref<1x128xf32, #tpu.memory_space<vmem>>, vector<1x128xf32>
      %17 = vector.broadcast %16 : vector<1x128xf32> to vector<256x128xf32>
      %18 = arith.addf %15, %17 : vector<256x128xf32>
      %cst_16 = arith.constant 0.000000e+00 : f32
      %19 = vector.broadcast %cst_16 : f32 to vector<256x128xf32>
      %20 = arith.maximumf %18, %19 : vector<256x128xf32>
      %c0_17 = arith.constant 0 : index
      %c0_18 = arith.constant 0 : index
      %21 = vector.load %arg7[%c0_17, %c0_18] : memref<256x128xf32, #tpu.memory_space<vmem>>, vector<256x128xf32>
      tpu.vector_store %arg7[%c0_17, %c0_18], %20 {strides = array<i32>} : memref<256x128xf32, #tpu.memory_space<vmem>>, vector<256x128xf32>,
    } else {
    }
    return
  }
  func.func @transform_0(%arg0: i32, %arg1: i32, %arg2: i32) -> (i32, i32) {
    %c0_i32 = arith.constant 0 : i32
    return %arg0, %arg2 : i32, i32
  }
  func.func @transform_1(%arg0: i32, %arg1: i32, %arg2: i32) -> (i32, i32) {
    %c0_i32 = arith.constant 0 : i32
    return %arg2, %arg1 : i32, i32
  }
  func.func @transform_2(%arg0: i32, %arg1: i32, %arg2: i32) -> (i32, i32) {
    %c0_i32 = arith.constant 0 : i32
    %c0_i32_0 = arith.constant 0 : i32
    return %c0_i32, %arg1 : i32, i32
  }
  func.func @transform_3(%arg0: i32, %arg1: i32, %arg2: i32) -> (i32, i32) {
    %c0_i32 = arith.constant 0 : i32
    %c0_i32_0 = arith.constant 0 : i32
    return %c0_i32, %arg1 : i32, i32
  }
  func.func @transform_4(%arg0: i32, %arg1: i32, %arg2: i32) -> (i32, i32) {
    %c0_i32 = arith.constant 0 : i32
    return %arg0, %arg1 : i32, i32
  }
}

</mosaic_0001>

<bundles_post_ra>
// kernel: _fused_matmul_impl.1
= control target key start
LH: loop header
LB: loop body
LE: loop exit
PB: predicated region body
PF: predicated region fallthrough
CT: control target
= control target key end

     0   :  { %9 = vsyncpa [#allocation4], 0  ;;  %s1964_s0 = inlined_call_operand.vmem [shape: bf16[512,256], index: 0, kind: input, shape index: {}]   ;;  %s1965_s1 = inlined_call_operand.vmem [shape: bf16[256,128], index: 1, kind: input, shape index: {}]   ;;  %s1966_s2 = inlined_call_operand.vmem [shape: f32[1,128], index: 2, kind: input, shape index: {}]   ;;  %s1967_s3 = inlined_call_operand.vmem [shape: f32[1,128], index: 3, kind: input, shape index: {}]   ;;  %s1968_s4 = inlined_call_operand.hbm [shape: f32[512,128], index: 4, kind: output, shape index: {}]  }
   0x1   :  { %11 = vsyncpa [#allocation4 + $0x1], 0  ;;  %s1655_s15 = smov 0   ;;  %s1657_s16 = smov 0  }
   0x2   :  { %s1659_s17 = smov 0   ;;  %s1661_s18 = smov 0  }
   0x3   :  { %s1663_s19 = smov 0   ;;  %s1665_s20 = smov 0  }
   0x4 LB: > { %s1229_s21 = sadd.s32 4294967295, %s1625_s20   ;;  %s1230_s22 = sadd.s32 4294967294, %s1625_s20   ;;  %s1625_s20 = sphi %s1665_s20, %s17_s20   ;;  %s1621_s19 = sphi %s1663_s19, %s1975_s19   ;;  %s1617_s18 = sphi %s1661_s18, %s1974_s18   ;;  %s1613_s17 = sphi %s1659_s17, %s1973_s17   ;;  %s1609_s16 = sphi %s1657_s16, %s1972_s16   ;;  %s1605_s15 = sphi %s1655_s15, %s1971_s15  }
   0x5   : > { %s36_s23 = sadd.s32 1, %s1621_s19  ;;  %s153_s24 = sadd.s32 1, %s1613_s17 }
   0x6   : > { %p38_p0 = scmp.ge.s32.totalorder %s36_s23, 2  ;;  %p163_p1 = scmp.ne.s32.totalorder %s1613_s17, %s1609_s16 }
   0x7   : > { %p164_p2 = scmp.eq.s32.totalorder %s1229_s21, 1  ;;  %p169_p3 = scmp.ne.s32.totalorder %s1609_s16, %s1605_s15 }
   0x8   : > { %s1977_s23 = smov (%p38_p0, %s36_s23), 0  ;;  %p170_p5 = scmp.eq.s32.totalorder %s1230_s22, 1 }
   0x9   : > { %p1695_p4 = por %p164_p2, %p163_p1  ;;  %s148_s26 = ssub.s32 %s1621_s19, %s1977_s23 }
   0xa   : > { %p1236_p6 = scmp.ge.s32.totalorder %s1625_s20, 1  ;;  %p151_p7 = scmp.eq.s32.totalorder %s148_s26, 0 }
   0xb   : > { %p1702_p8 = por %p170_p5, %p169_p3  ;;  %p227_p9 = scmp.lt.s32.totalorder %s1625_s20, 3 }
   0xc   : > { %s1708_s28 = scalar_select %p151_p7, %s1613_s17, %s153_s24  }
   0xd   : > { %p228_p10 = pnand %p1236_p6, %p227_p9 }
   0xe   : > { %v1483_v0 = vld [vmem:[%s1965_s1 + $0x40] sm:$0xff] (!%p228_p10)   ;;  %s1238_s5 = sshll.u32 (!%p228_p10), %s1617_s18, 5  ;;  %v1485_v2 = vld [vmem:[%s1965_s1 + $0x48] sm:$0xff] (!%p228_p10)   ;;  %v1487_v4 = vld [vmem:[%s1965_s1 + $0x50] sm:$0xff] (!%p228_p10)   ;;  %s269_s9 = sand.u32 (!%p228_p10), 1, %s1609_s16  }
   0xf   : > { %231 = sbr.rel (%p228_p10) target bundleno = 342 (0x156), region = 36  ;;  %v1484_v1 = vld [vmem:[%s1965_s1] sm:$0xff] (!%p228_p10)   ;;  %1298 = vmatprep.subr.bf16.mxu0 (!%p228_p10), %v1483_v0  ;;  %1410 = vmatprep.subr.bf16.mxu1 (!%p228_p10), %v1483_v0  ;;  %v1486_v3 = vld [vmem:[%s1965_s1 + $0x8] sm:$0xff] (!%p228_p10)   ;;  %p274_p11 = scmp.lt.s32.totalorder (!%p228_p10), %s1238_s5, 63  ;;  %v1488_v5 = vld [vmem:[%s1965_s1 + $0x10] sm:$0xff] (!%p228_p10)  }
  0x10   : > { %1299 = vmatpush3.bf16.msra.mxu0 (!%p228_p10), %v1484_v1  ;;  %1418 = vmatpush3.bf16.msra.mxu1 (!%p228_p10), %v1484_v1  ;;  %v1489_v6 = vld [vmem:[%s1965_s1 + $0x58] sm:$0xff] (!%p228_p10)   ;;  %v1491_v8 = vld [vmem:[%s1965_s1 + $0x60] sm:$0xff] (!%p228_p10)   ;;  %v1493_v10 = vld [vmem:[%s1965_s1 + $0x68] sm:$0xff] (!%p228_p10)   ;;  %s1297_s21 = sshll.u32 (!%p228_p10), %s1617_s18, 12  ;;  %s1918_s18 = scalar_lea.sflag (!%p228_p10), [#allocation4], %s269_s9 }
  0x11   : > { %1300 = vmatprep.subr.bf16.mxu0 (!%p228_p10), %v1485_v2  ;;  %1411 = vmatprep.subr.bf16.mxu1 (!%p228_p10), %v1485_v2  ;;  %v1490_v7 = vld [vmem:[%s1965_s1 + $0x18] sm:$0xff] (!%p228_p10)   ;;  %v1492_v9 = vld [vmem:[%s1965_s1 + $0x20] sm:$0xff] (!%p228_p10)   ;;  %v1494_v13 = vld [vmem:[%s1965_s1 + $0x28] sm:$0xff] (!%p228_p10)   ;;  %s1908_s29 = scalar_lea.hbm (!%p228_p10), %s1968_s4, %s1297_s21  ;;  %s1627_s6 = smov (!%p228_p10), [#allocation3]  }
  0x12   : > { %v1495_v14 = vld [vmem:[%s1965_s1 + $0x70] sm:$0xff] (!%p228_p10)   ;;  %v1497_v16 = vld [vmem:[%s1965_s1 + $0x78] sm:$0xff] (!%p228_p10)   ;;  %v1800_v51 = vld [vmem:[%s1966_s2] ss:$0 sm:$0xff] (!%p228_p10)  ;;  %s1551_s7 = sshll.u32 (!%p228_p10), %s1627_s6, 4  ;;  %s1552_s7 = int_to_ptr.vmem [resolvable:$false] %s1551_s7 }
  0x13   : > { %v1496_v15 = vld [vmem:[%s1965_s1 + $0x30] sm:$0xff] (!%p228_p10)   ;;  %v1498_v17 = vld [vmem:[%s1965_s1 + $0x38] sm:$0xff] (!%p228_p10)   ;;  %v1805_v57 = vld [vmem:[%s1967_s3] ss:$0 sm:$0xff] (!%p228_p10)  ;;  %s1553_s8 = scalar_lea.vmem (!%p228_p10), %s1552_s7, 8192 }
  0x14   : > { %1301 = vmatpush3.bf16.msra.mxu0 (!%p228_p10), %v1486_v3  ;;  %1419 = vmatpush3.bf16.msra.mxu1 (!%p228_p10), %v1486_v3 }
  0x15   : > { %1302 = vmatprep.subr.bf16.mxu0 (!%p228_p10), %v1487_v4  ;;  %1412 = vmatprep.subr.bf16.mxu1 (!%p228_p10), %v1487_v4 }
  0x16   : > { %s1979_s5 = smov (!%p274_p11, %s1238_s5), 63 }
  0x17   : > { %s1296_s30 = sshll.u32 %s1979_s5, 3 }
  0x18   : > { %1303 = vmatpush3.bf16.msra.mxu0 %v1488_v5  ;;  %1420 = vmatpush3.bf16.msra.mxu1 %v1488_v5  ;;  %s1741_s10 = scalar_lea.vmem %s1964_s0, %s1296_s30 }
  0x19   : > { %1304 = vmatprep.subr.bf16.mxu0 %v1489_v6  ;;  %1413 = vmatprep.subr.bf16.mxu1 %v1489_v6  ;;  %v1501_v11 = vld [vmem:[%s1741_s10 + $0x4] ss:$8 sps:$4 sm:$0xff]   ;;  %v1499_v18 = vld [vmem:[%s1741_s10] ss:$8 sps:$4 sm:$0xff]   ;;  %v1505_v20 = vld [vmem:[%s1741_s10 + $0x14] ss:$8 sps:$4 sm:$0xff]  }
  0x1a   : > { %v1504_v12 = vld [vmem:[%s1741_s10 + $0x84] ss:$8 sps:$4 sm:$0xff]   ;;  %721 = vmatprep.mubr.bf16.mxu0 %v1501_v11  ;;  %v1502_v19 = vld [vmem:[%s1741_s10 + $0x80] ss:$8 sps:$4 sm:$0xff]   ;;  %v1507_v21 = vld [vmem:[%s1741_s10 + $0x94] ss:$8 sps:$4 sm:$0xff]  }
  0x1b   : > { %785 = vmatprep.mubr.bf16.mxu1 %v1504_v12  ;;  %v1509_v22 = vld [vmem:[%s1741_s10 + $0x10] ss:$8 sps:$4 sm:$0xff]   ;;  %v1511_v24 = vld [vmem:[%s1741_s10 + $0x24] ss:$8 sps:$4 sm:$0xff]   ;;  %v1515_v26 = vld [vmem:[%s1741_s10 + $0x20] ss:$8 sps:$4 sm:$0xff]  }
  0x1c   : > { %1305 = vmatpush3.bf16.msra.mxu0 %v1490_v7  ;;  %1421 = vmatpush3.bf16.msra.mxu1 %v1490_v7  ;;  %v1510_v23 = vld [vmem:[%s1741_s10 + $0x90] ss:$8 sps:$4 sm:$0xff]   ;;  %v1513_v25 = vld [vmem:[%s1741_s10 + $0xa4] ss:$8 sps:$4 sm:$0xff]   ;;  %v1516_v27 = vld [vmem:[%s1741_s10 + $0xa0] ss:$8 sps:$4 sm:$0xff]  }
  0x1d   : > { %1306 = vmatprep.subr.bf16.mxu0 %v1491_v8  ;;  %1414 = vmatprep.subr.bf16.mxu1 %v1491_v8  ;;  %v1517_v28 = vld [vmem:[%s1741_s10 + $0x34] ss:$8 sps:$4 sm:$0xff]   ;;  %v1521_v30 = vld [vmem:[%s1741_s10 + $0x30] ss:$8 sps:$4 sm:$0xff]   ;;  %v1523_v32 = vld [vmem:[%s1741_s10 + $0x44] ss:$8 sps:$4 sm:$0xff]  }
  0x1e   : > { %v1519_v29 = vld [vmem:[%s1741_s10 + $0xb4] ss:$8 sps:$4 sm:$0xff]   ;;  %v1522_v31 = vld [vmem:[%s1741_s10 + $0xb0] ss:$8 sps:$4 sm:$0xff]   ;;  %v1525_v33 = vld [vmem:[%s1741_s10 + $0xc4] ss:$8 sps:$4 sm:$0xff]  }
  0x1f   : > { %v1527_v34 = vld [vmem:[%s1741_s10 + $0x40] ss:$8 sps:$4 sm:$0xff]   ;;  %v1529_v36 = vld [vmem:[%s1741_s10 + $0x54] ss:$8 sps:$4 sm:$0xff]   ;;  %v1533_v38 = vld [vmem:[%s1741_s10 + $0x50] ss:$8 sps:$4 sm:$0xff]  }
  0x20   : > { %1307 = vmatpush3.bf16.msra.mxu0 %v1492_v9  ;;  %1422 = vmatpush3.bf16.msra.mxu1 %v1492_v9  ;;  %v1528_v35 = vld [vmem:[%s1741_s10 + $0xc0] ss:$8 sps:$4 sm:$0xff]   ;;  %v1531_v37 = vld [vmem:[%s1741_s10 + $0xd4] ss:$8 sps:$4 sm:$0xff]   ;;  %v1534_v39 = vld [vmem:[%s1741_s10 + $0xd0] ss:$8 sps:$4 sm:$0xff]  }
  0x21   : > { %1308 = vmatprep.subr.bf16.mxu0 %v1493_v10  ;;  %1415 = vmatprep.subr.bf16.mxu1 %v1493_v10  ;;  %v1535_v40 = vld [vmem:[%s1741_s10 + $0x64] ss:$8 sps:$4 sm:$0xff]   ;;  %v1539_v42 = vld [vmem:[%s1741_s10 + $0x60] ss:$8 sps:$4 sm:$0xff]   ;;  %v1541_v44 = vld [vmem:[%s1741_s10 + $0x74] ss:$8 sps:$4 sm:$0xff]  }
  0x22   : > { %v1537_v41 = vld [vmem:[%s1741_s10 + $0xe4] ss:$8 sps:$4 sm:$0xff]   ;;  %v1540_v43 = vld [vmem:[%s1741_s10 + $0xe0] ss:$8 sps:$4 sm:$0xff]   ;;  %v1543_v45 = vld [vmem:[%s1741_s10 + $0xf4] ss:$8 sps:$4 sm:$0xff]  }
  0x23   : > { %v1545_v46 = vld [vmem:[%s1741_s10 + $0x70] ss:$8 sps:$4 sm:$0xff]  }
  0x24   : > { %1309 = vmatpush3.bf16.msra.mxu0 %v1494_v13  ;;  %1423 = vmatpush3.bf16.msra.mxu1 %v1494_v13  ;;  %v1546_v47 = vld [vmem:[%s1741_s10 + $0xf0] ss:$8 sps:$4 sm:$0xff]   ;;  %s1237_s10 = sshll.u32 %s269_s9, 8 }
  0x25   : > { %1310 = vmatprep.subr.bf16.mxu0 %v1495_v14  ;;  %1416 = vmatprep.subr.bf16.mxu1 %v1495_v14  ;;  %s1817_s14 = scalar_lea.vmem [#allocation3], %s1237_s10 }
  0x26   : > { %s1106_s22 = sshll.u32 %s1817_s14, 4  ;;  %s1910_s22 = int_to_ptr.vmem [resolvable:$true] %s1106_s22 }
  0x27   : > { %s1547_s30 = scalar_lea.vmem %s1910_s22, 4096  ;;  %p1554_p1 = scmp.lt.s32.totalorder %s1910_s22, %s1552_s7 }
  0x28   : > { %1311 = vmatpush3.bf16.msra.mxu0 %v1496_v15  ;;  %1424 = vmatpush3.bf16.msra.mxu1 %v1496_v15  ;;  %p1548_p12 = scmp.ne.s32.totalorder %s1910_s22, %s1547_s30  ;;  %p1555_p2 = scmp.lt.s32.totalorder %s1553_s8, %s1547_s30 }
  0x29   : > { %1312 = vmatprep.subr.bf16.mxu0 %v1497_v16  ;;  %1417 = vmatprep.subr.bf16.mxu1 %v1497_v16 }
  0x2a   : > { %p1549_p13 = pnand %p1548_p12, %p1695_p4  ;;  %p1556_p3 = por %p1555_p2, %p1554_p1 }
  0x2c   : > { %1313 = vmatpush3.bf16.msra.mxu0 %v1498_v17  ;;  %1425 = vmatpush3.bf16.msra.mxu1 %v1498_v17  ;;  %p1550_p0 = pneg %p1549_p13 }
  0x2e   : > { %p1557_p5 = pnand %p1556_p3, %p1550_p0 }
  0x2f   : > { %722 = vmatmul.mubr.bf16.vlgmr.msra.gmra.mrb[0].mxu0 %v1499_v18  ;;  %786 = vmatmul.mubr.bf16.vlgmr.msra.gmra.mrb[0].mxu1 %v1502_v19 }
  0x30   : > { %729 = vmatprep.mubr.bf16.mxu0 %v1505_v20  ;;  %793 = vmatprep.mubr.bf16.mxu1 %v1507_v21 }
  0x37   : > { %730 = vmatmul.mubr.bf16.gmra.mrb[4].mxu0 %v1509_v22  ;;  %794 = vmatmul.mubr.bf16.gmra.mrb[4].mxu1 %v1510_v23 }
  0x38   : > { %737 = vmatprep.mubr.bf16.mxu0 %v1511_v24  ;;  %801 = vmatprep.mubr.bf16.mxu1 %v1513_v25 }
  0x3f   : > { %738 = vmatmul.mubr.bf16.gmra.mrb[8].mxu0 %v1515_v26  ;;  %802 = vmatmul.mubr.bf16.gmra.mrb[8].mxu1 %v1516_v27 }
  0x40   : > { %745 = vmatprep.mubr.bf16.mxu0 %v1517_v28  ;;  %809 = vmatprep.mubr.bf16.mxu1 %v1519_v29 }
  0x47   : > { %746 = vmatmul.mubr.bf16.gmra.mrb[12].mxu0 %v1521_v30  ;;  %810 = vmatmul.mubr.bf16.gmra.mrb[12].mxu1 %v1522_v31 }
  0x48   : > { %753 = vmatprep.mubr.bf16.mxu0 %v1523_v32  ;;  %817 = vmatprep.mubr.bf16.mxu1 %v1525_v33 }
  0x4f   : > { %754 = vmatmul.mubr.bf16.gmra.mrb[16].mxu0 %v1527_v34  ;;  %818 = vmatmul.mubr.bf16.gmra.mrb[16].mxu1 %v1528_v35 }
  0x50   : > { %761 = vmatprep.mubr.bf16.mxu0 %v1529_v36  ;;  %825 = vmatprep.mubr.bf16.mxu1 %v1531_v37 }
  0x57   : > { %762 = vmatmul.mubr.bf16.gmra.mrb[20].mxu0 %v1533_v38  ;;  %826 = vmatmul.mubr.bf16.gmra.mrb[20].mxu1 %v1534_v39 }
  0x58   : > { %769 = vmatprep.mubr.bf16.mxu0 %v1535_v40  ;;  %833 = vmatprep.mubr.bf16.mxu1 %v1537_v41 }
  0x5f   : > { %770 = vmatmul.mubr.bf16.gmra.mrb[24].mxu0 %v1539_v42  ;;  %834 = vmatmul.mubr.bf16.gmra.mrb[24].mxu1 %v1540_v43 }
  0x60   : > { %777 = vmatprep.mubr.bf16.mxu0 %v1541_v44  ;;  %841 = vmatprep.mubr.bf16.mxu1 %v1543_v45 }
  0x67   : > { %778 = vmatmul.mubr.bf16.gmra.mrb[28].mxu0 %v1545_v46  ;;  %842 = vmatmul.mubr.bf16.gmra.mrb[28].mxu1 %v1546_v47 }
 0x102   : > { %v1314_v48 = vpop.f32.mrb[0].mxu0  ;;  %v1362_v49 = vpop.f32.mrb[0].mxu1 }
 0x103   : > { %v1315_v50 = vpop.f32.mrb[1].mxu0  ;;  %v1363_v52 = vpop.f32.mrb[1].mxu1 }
 0x104   : > { %v1316_v53 = vadd.f32 %v1315_v50, %v1314_v48  ;;  %v1364_v54 = vadd.f32 %v1363_v52, %v1362_v49  ;;  %v1317_v55 = vpop.f32.mrb[2].mxu0  ;;  %v1365_v56 = vpop.f32.mrb[2].mxu1 }
 0x105   : > { %v1318_v58 = vpop.f32.mrb[3].mxu0  ;;  %v1366_v59 = vpop.f32.mrb[3].mxu1 }
 0x106   : > { %v956_v60 = vmul.f32 %v1316_v53, %v1800_v51  ;;  %v972_v61 = vmul.f32 %v1364_v54, %v1800_v51  ;;  %v1319_v62 = vadd.f32 %v1318_v58, %v1317_v55  ;;  %v1367_v63 = vadd.f32 %v1366_v59, %v1365_v56 }
 0x108   : > { %v995_v0 = vadd.f32 %v1805_v57, %v956_v60  ;;  %v1011_v1 = vadd.f32 %v1805_v57, %v972_v61  ;;  %v957_v2 = vmul.f32 %v1319_v62, %v1800_v51  ;;  %v973_v3 = vmul.f32 %v1367_v63, %v1800_v51 }
 0x10a   : > { %v1027_v4 = vmax.f32 %v995_v0, 0.0  ;;  %v1043_v5 = vmax.f32 %v1011_v1, 0.0  ;;  %v996_v6 = vadd.f32 %v1805_v57, %v957_v2  ;;  %v1012_v7 = vadd.f32 %v1805_v57, %v973_v3  ;;  %v1320_v8 = vpop.f32.mrb[4].mxu0  ;;  %v1368_v9 = vpop.f32.mrb[4].mxu1 }
 0x10b   : > { %v1321_v10 = vpop.f32.mrb[5].mxu0  ;;  %v1369_v11 = vpop.f32.mrb[5].mxu1 }
 0x10c   : > { %1059 = vst [vmem:[%s1817_s14] sm:$0xff] %v1027_v4  ;;  %1075 = vst [vmem:[%s1817_s14 + $0x80] sm:$0xff] %v1043_v5  ;;  %v1028_v12 = vmax.f32 %v996_v6, 0.0  ;;  %v1044_v13 = vmax.f32 %v1012_v7, 0.0  ;;  %v1322_v14 = vadd.f32 %v1321_v10, %v1320_v8  ;;  %v1370_v15 = vadd.f32 %v1369_v11, %v1368_v9  ;;  %v1323_v16 = vpop.f32.mrb[6].mxu0  ;;  %v1371_v17 = vpop.f32.mrb[6].mxu1 }
 0x10d   : > { %v1324_v18 = vpop.f32.mrb[7].mxu0  ;;  %v1372_v19 = vpop.f32.mrb[7].mxu1 }
 0x10e   : > { %1060 = vst [vmem:[%s1817_s14 + $0x8] sm:$0xff] %v1028_v12  ;;  %1076 = vst [vmem:[%s1817_s14 + $0x88] sm:$0xff] %v1044_v13  ;;  %v958_v20 = vmul.f32 %v1322_v14, %v1800_v51  ;;  %v974_v21 = vmul.f32 %v1370_v15, %v1800_v51  ;;  %v1325_v22 = vadd.f32 %v1324_v18, %v1323_v16 }
 0x10f   : > { %v1373_v23 = vadd.f32 %v1372_v19, %v1371_v17 }
 0x110   : > { %v997_v24 = vadd.f32 %v1805_v57, %v958_v20  ;;  %v1013_v25 = vadd.f32 %v1805_v57, %v974_v21  ;;  %v959_v26 = vmul.f32 %v1325_v22, %v1800_v51 }
 0x111   : > { %v975_v27 = vmul.f32 %v1373_v23, %v1800_v51 }
 0x112   : > { %v1029_v28 = vmax.f32 %v997_v24, 0.0  ;;  %v1045_v29 = vmax.f32 %v1013_v25, 0.0  ;;  %v998_v30 = vadd.f32 %v1805_v57, %v959_v26  ;;  %v1326_v32 = vpop.f32.mrb[8].mxu0  ;;  %v1374_v33 = vpop.f32.mrb[8].mxu1 }
 0x113   : > { %v1014_v31 = vadd.f32 %v1805_v57, %v975_v27  ;;  %v1327_v34 = vpop.f32.mrb[9].mxu0  ;;  %v1375_v35 = vpop.f32.mrb[9].mxu1 }
 0x114   : > { %1061 = vst [vmem:[%s1817_s14 + $0x10] sm:$0xff] %v1029_v28  ;;  %1077 = vst [vmem:[%s1817_s14 + $0x90] sm:$0xff] %v1045_v29  ;;  %v1030_v36 = vmax.f32 %v998_v30, 0.0  ;;  %v1328_v38 = vadd.f32 %v1327_v34, %v1326_v32  ;;  %v1376_v39 = vadd.f32 %v1375_v35, %v1374_v33  ;;  %v1329_v40 = vpop.f32.mrb[10].mxu0  ;;  %v1377_v41 = vpop.f32.mrb[10].mxu1 }
 0x115   : > { %v1046_v37 = vmax.f32 %v1014_v31, 0.0  ;;  %v1330_v42 = vpop.f32.mrb[11].mxu0  ;;  %v1378_v43 = vpop.f32.mrb[11].mxu1 }
 0x116   : > { %1062 = vst [vmem:[%s1817_s14 + $0x18] sm:$0xff] %v1030_v36  ;;  %v960_v44 = vmul.f32 %v1328_v38, %v1800_v51  ;;  %v976_v45 = vmul.f32 %v1376_v39, %v1800_v51  ;;  %v1331_v46 = vadd.f32 %v1330_v42, %v1329_v40  ;;  %v1379_v47 = vadd.f32 %v1378_v43, %v1377_v41 }
 0x117   : > { %1078 = vst [vmem:[%s1817_s14 + $0x98] sm:$0xff] %v1046_v37 }
 0x118   : > { %v999_v48 = vadd.f32 %v1805_v57, %v960_v44  ;;  %v1015_v49 = vadd.f32 %v1805_v57, %v976_v45  ;;  %v961_v50 = vmul.f32 %v1331_v46, %v1800_v51  ;;  %v977_v52 = vmul.f32 %v1379_v47, %v1800_v51 }
 0x11a   : > { %v1031_v53 = vmax.f32 %v999_v48, 0.0  ;;  %v1047_v54 = vmax.f32 %v1015_v49, 0.0  ;;  %v1000_v55 = vadd.f32 %v1805_v57, %v961_v50  ;;  %v1016_v56 = vadd.f32 %v1805_v57, %v977_v52  ;;  %v1332_v58 = vpop.f32.mrb[12].mxu0  ;;  %v1380_v59 = vpop.f32.mrb[12].mxu1 }
 0x11b   : > { %v1333_v60 = vpop.f32.mrb[13].mxu0  ;;  %v1381_v61 = vpop.f32.mrb[13].mxu1 }
 0x11c   : > { %1063 = vst [vmem:[%s1817_s14 + $0x20] sm:$0xff] %v1031_v53  ;;  %1079 = vst [vmem:[%s1817_s14 + $0xa0] sm:$0xff] %v1047_v54  ;;  %v1032_v62 = vmax.f32 %v1000_v55, 0.0  ;;  %v1048_v63 = vmax.f32 %v1016_v56, 0.0  ;;  %v1334_v0 = vadd.f32 %v1333_v60, %v1332_v58  ;;  %v1382_v1 = vadd.f32 %v1381_v61, %v1380_v59  ;;  %v1335_v2 = vpop.f32.mrb[14].mxu0  ;;  %v1383_v3 = vpop.f32.mrb[14].mxu1 }
 0x11d   : > { %v1336_v4 = vpop.f32.mrb[15].mxu0  ;;  %v1384_v5 = vpop.f32.mrb[15].mxu1 }
 0x11e   : > { %1064 = vst [vmem:[%s1817_s14 + $0x28] sm:$0xff] %v1032_v62  ;;  %1080 = vst [vmem:[%s1817_s14 + $0xa8] sm:$0xff] %v1048_v63  ;;  %v962_v6 = vmul.f32 %v1334_v0, %v1800_v51  ;;  %v978_v7 = vmul.f32 %v1382_v1, %v1800_v51  ;;  %v1337_v8 = vadd.f32 %v1336_v4, %v1335_v2 }
 0x11f   : > { %v1385_v9 = vadd.f32 %v1384_v5, %v1383_v3 }
 0x120   : > { %v1001_v10 = vadd.f32 %v1805_v57, %v962_v6  ;;  %v1017_v11 = vadd.f32 %v1805_v57, %v978_v7  ;;  %v963_v12 = vmul.f32 %v1337_v8, %v1800_v51 }
 0x121   : > { %v979_v13 = vmul.f32 %v1385_v9, %v1800_v51 }
 0x122   : > { %v1033_v14 = vmax.f32 %v1001_v10, 0.0  ;;  %v1049_v15 = vmax.f32 %v1017_v11, 0.0  ;;  %v1002_v16 = vadd.f32 %v1805_v57, %v963_v12  ;;  %v1338_v18 = vpop.f32.mrb[16].mxu0  ;;  %v1386_v19 = vpop.f32.mrb[16].mxu1 }
 0x123   : > { %v1018_v17 = vadd.f32 %v1805_v57, %v979_v13  ;;  %v1339_v20 = vpop.f32.mrb[17].mxu0  ;;  %v1387_v21 = vpop.f32.mrb[17].mxu1 }
 0x124   : > { %1065 = vst [vmem:[%s1817_s14 + $0x30] sm:$0xff] %v1033_v14  ;;  %1081 = vst [vmem:[%s1817_s14 + $0xb0] sm:$0xff] %v1049_v15  ;;  %v1034_v22 = vmax.f32 %v1002_v16, 0.0  ;;  %v1340_v24 = vadd.f32 %v1339_v20, %v1338_v18  ;;  %v1388_v25 = vadd.f32 %v1387_v21, %v1386_v19  ;;  %v1341_v26 = vpop.f32.mrb[18].mxu0  ;;  %v1389_v27 = vpop.f32.mrb[18].mxu1 }
 0x125   : > { %v1050_v23 = vmax.f32 %v1018_v17, 0.0  ;;  %v1342_v28 = vpop.f32.mrb[19].mxu0  ;;  %v1390_v29 = vpop.f32.mrb[19].mxu1 }
 0x126   : > { %1066 = vst [vmem:[%s1817_s14 + $0x38] sm:$0xff] %v1034_v22  ;;  %v964_v30 = vmul.f32 %v1340_v24, %v1800_v51  ;;  %v980_v31 = vmul.f32 %v1388_v25, %v1800_v51  ;;  %v1343_v32 = vadd.f32 %v1342_v28, %v1341_v26  ;;  %v1391_v33 = vadd.f32 %v1390_v29, %v1389_v27 }
 0x127   : > { %1082 = vst [vmem:[%s1817_s14 + $0xb8] sm:$0xff] %v1050_v23 }
 0x128   : > { %v1003_v34 = vadd.f32 %v1805_v57, %v964_v30  ;;  %v1019_v35 = vadd.f32 %v1805_v57, %v980_v31  ;;  %v965_v36 = vmul.f32 %v1343_v32, %v1800_v51  ;;  %v981_v37 = vmul.f32 %v1391_v33, %v1800_v51 }
 0x12a   : > { %v1035_v38 = vmax.f32 %v1003_v34, 0.0  ;;  %v1051_v39 = vmax.f32 %v1019_v35, 0.0  ;;  %v1004_v40 = vadd.f32 %v1805_v57, %v965_v36  ;;  %v1020_v41 = vadd.f32 %v1805_v57, %v981_v37  ;;  %v1344_v42 = vpop.f32.mrb[20].mxu0  ;;  %v1392_v43 = vpop.f32.mrb[20].mxu1 }
 0x12b   : > { %v1345_v44 = vpop.f32.mrb[21].mxu0  ;;  %v1393_v45 = vpop.f32.mrb[21].mxu1 }
 0x12c   : > { %1067 = vst [vmem:[%s1817_s14 + $0x40] sm:$0xff] %v1035_v38  ;;  %1083 = vst [vmem:[%s1817_s14 + $0xc0] sm:$0xff] %v1051_v39  ;;  %v1036_v46 = vmax.f32 %v1004_v40, 0.0  ;;  %v1052_v47 = vmax.f32 %v1020_v41, 0.0  ;;  %v1346_v48 = vadd.f32 %v1345_v44, %v1344_v42  ;;  %v1394_v49 = vadd.f32 %v1393_v45, %v1392_v43  ;;  %v1347_v50 = vpop.f32.mrb[22].mxu0  ;;  %v1395_v52 = vpop.f32.mrb[22].mxu1 }
 0x12d   : > { %v1348_v53 = vpop.f32.mrb[23].mxu0  ;;  %v1396_v54 = vpop.f32.mrb[23].mxu1 }
 0x12e   : > { %1068 = vst [vmem:[%s1817_s14 + $0x48] sm:$0xff] %v1036_v46  ;;  %1084 = vst [vmem:[%s1817_s14 + $0xc8] sm:$0xff] %v1052_v47  ;;  %v966_v55 = vmul.f32 %v1346_v48, %v1800_v51  ;;  %v982_v56 = vmul.f32 %v1394_v49, %v1800_v51  ;;  %v1349_v58 = vadd.f32 %v1348_v53, %v1347_v50 }
 0x12f   : > { %v1397_v59 = vadd.f32 %v1396_v54, %v1395_v52 }
 0x130   : > { %v1005_v60 = vadd.f32 %v1805_v57, %v966_v55  ;;  %v1021_v61 = vadd.f32 %v1805_v57, %v982_v56  ;;  %v967_v62 = vmul.f32 %v1349_v58, %v1800_v51 }
 0x131   : > { %v983_v63 = vmul.f32 %v1397_v59, %v1800_v51 }
 0x132   : > { %v1037_v0 = vmax.f32 %v1005_v60, 0.0  ;;  %v1053_v1 = vmax.f32 %v1021_v61, 0.0  ;;  %v1006_v2 = vadd.f32 %v1805_v57, %v967_v62  ;;  %v1350_v4 = vpop.f32.mrb[24].mxu0  ;;  %v1398_v5 = vpop.f32.mrb[24].mxu1 }
 0x133   : > { %v1022_v3 = vadd.f32 %v1805_v57, %v983_v63  ;;  %v1351_v6 = vpop.f32.mrb[25].mxu0  ;;  %v1399_v7 = vpop.f32.mrb[25].mxu1 }
 0x134   : > { %1069 = vst [vmem:[%s1817_s14 + $0x50] sm:$0xff] %v1037_v0  ;;  %1085 = vst [vmem:[%s1817_s14 + $0xd0] sm:$0xff] %v1053_v1  ;;  %v1038_v8 = vmax.f32 %v1006_v2, 0.0  ;;  %v1352_v10 = vadd.f32 %v1351_v6, %v1350_v4  ;;  %v1400_v11 = vadd.f32 %v1399_v7, %v1398_v5  ;;  %v1353_v12 = vpop.f32.mrb[26].mxu0  ;;  %v1401_v13 = vpop.f32.mrb[26].mxu1 }
 0x135   : > { %v1054_v9 = vmax.f32 %v1022_v3, 0.0  ;;  %v1354_v14 = vpop.f32.mrb[27].mxu0  ;;  %v1402_v15 = vpop.f32.mrb[27].mxu1 }
 0x136   : > { %1070 = vst [vmem:[%s1817_s14 + $0x58] sm:$0xff] %v1038_v8  ;;  %v968_v16 = vmul.f32 %v1352_v10, %v1800_v51  ;;  %v984_v17 = vmul.f32 %v1400_v11, %v1800_v51  ;;  %v1355_v18 = vadd.f32 %v1354_v14, %v1353_v12  ;;  %v1403_v19 = vadd.f32 %v1402_v15, %v1401_v13 }
 0x137   : > { %1086 = vst [vmem:[%s1817_s14 + $0xd8] sm:$0xff] %v1054_v9 }
 0x138   : > { %v1007_v20 = vadd.f32 %v1805_v57, %v968_v16  ;;  %v1023_v21 = vadd.f32 %v1805_v57, %v984_v17  ;;  %v969_v22 = vmul.f32 %v1355_v18, %v1800_v51  ;;  %v985_v23 = vmul.f32 %v1403_v19, %v1800_v51 }
 0x13a   : > { %v1039_v24 = vmax.f32 %v1007_v20, 0.0  ;;  %v1055_v25 = vmax.f32 %v1023_v21, 0.0  ;;  %v1008_v26 = vadd.f32 %v1805_v57, %v969_v22  ;;  %v1024_v27 = vadd.f32 %v1805_v57, %v985_v23  ;;  %v1356_v28 = vpop.f32.mrb[28].mxu0  ;;  %v1404_v29 = vpop.f32.mrb[28].mxu1 }
 0x13b   : > { %v1357_v30 = vpop.f32.mrb[29].mxu0  ;;  %v1405_v31 = vpop.f32.mrb[29].mxu1 }
 0x13c   : > { %1071 = vst [vmem:[%s1817_s14 + $0x60] sm:$0xff] %v1039_v24  ;;  %1087 = vst [vmem:[%s1817_s14 + $0xe0] sm:$0xff] %v1055_v25  ;;  %v1040_v32 = vmax.f32 %v1008_v26, 0.0  ;;  %v1056_v33 = vmax.f32 %v1024_v27, 0.0  ;;  %v1358_v34 = vadd.f32 %v1357_v30, %v1356_v28  ;;  %v1406_v35 = vadd.f32 %v1405_v31, %v1404_v29  ;;  %v1359_v36 = vpop.f32.mrb[30].mxu0  ;;  %v1407_v37 = vpop.f32.mrb[30].mxu1 }
 0x13d   : > { %v1360_v38 = vpop.f32.mrb[31].mxu0  ;;  %v1408_v39 = vpop.f32.mrb[31].mxu1 }
 0x13e   : > { %1072 = vst [vmem:[%s1817_s14 + $0x68] sm:$0xff] %v1040_v32  ;;  %1088 = vst [vmem:[%s1817_s14 + $0xe8] sm:$0xff] %v1056_v33  ;;  %v970_v40 = vmul.f32 %v1358_v34, %v1800_v51  ;;  %v986_v41 = vmul.f32 %v1406_v35, %v1800_v51  ;;  %v1361_v42 = vadd.f32 %v1360_v38, %v1359_v36 }
 0x13f   : > { %v1409_v43 = vadd.f32 %v1408_v39, %v1407_v37 }
 0x140   : > { %v1009_v44 = vadd.f32 %v1805_v57, %v970_v40  ;;  %v1025_v45 = vadd.f32 %v1805_v57, %v986_v41  ;;  %v971_v46 = vmul.f32 %v1361_v42, %v1800_v51 }
 0x141   : > { %v987_v47 = vmul.f32 %v1409_v43, %v1800_v51 }
 0x142   : > { %v1041_v48 = vmax.f32 %v1009_v44, 0.0  ;;  %v1057_v49 = vmax.f32 %v1025_v45, 0.0  ;;  %v1010_v50 = vadd.f32 %v1805_v57, %v971_v46 }
 0x143   : > { %v1026_v52 = vadd.f32 %v1805_v57, %v987_v47 }
 0x144   : > { %1073 = vst [vmem:[%s1817_s14 + $0x70] sm:$0xff] %v1041_v48  ;;  %1089 = vst [vmem:[%s1817_s14 + $0xf0] sm:$0xff] %v1057_v49  ;;  %v1042_v51 = vmax.f32 %v1010_v50, 0.0 }
 0x145   : > { %v1058_v53 = vmax.f32 %v1026_v52, 0.0 }
 0x146   : > { %1074 = vst [vmem:[%s1817_s14 + $0x78] sm:$0xff] %v1042_v51 }
 0x147   : > { %1090 = vst [vmem:[%s1817_s14 + $0xf8] sm:$0xff] %v1058_v53 }
 0x148   : > { %1560 = shalt.err (!%p1557_p5)
}
 0x149   : > { %s1561_s9 = scalar_lea.hbm %s1908_s29, 4096  ;;  %s1565_s5 = scalar_lea.hbm %s1968_s4, 8192 }
 0x14a   : > { %p1562_p6 = scmp.ne.s32.totalorder %s1908_s29, %s1561_s9  ;;  %p1566_p10 = scmp.lt.u32.totalorder %s1908_s29, %s1968_s4 }
 0x14b   : > { %p1567_p11 = scmp.lt.u32.totalorder %s1565_s5, %s1561_s9  ;;  %p1569_p13 = scmp.lt.u32.totalorder %s1561_s9, %s1908_s29 }
 0x14c   : > { %p1563_p7 = pnand %p1562_p6, %p1695_p4 }
 0x14d   : > { %p1568_p12 = por %p1567_p11, %p1566_p10 }
 0x14e   : > { %p1564_p9 = pneg %p1563_p7 }
 0x14f   : > { %p1570_p0 = por %p1569_p13, %p1568_p12 }
 0x151   : > { %p1571_p1 = pnand %p1570_p0, %p1564_p9 }
 0x153   : > { %1574 = shalt.err (!%p1571_p1)
}
 0x154   : > { %s1628_s14 = smov 128   ;;  %s1629_s21 = smov 8  }
 0x155   : > { %1426 = dma.vmem_to_hbm [thread:$0]  (%p1695_p4), %s1910_s22, 4096, %s1908_s29, %s1918_s18, %s1628_s14, %s1628_s14, %s1629_s21  }
 0x156 PF: > { %p1432_p2 = scmp.ge.s32.totalorder %s1625_s20, 2  ;;  %s1121_s24 = sand.u32 1, %s1605_s15  }
 0x157   : > { %s1122_s26 = scalar_lea.sflag [#allocation4], %s1121_s24 }
 0x158   : > { %p1429_p3 = pnand %p1432_p2, %p1702_p8 }
 0x15a   : > { %1600 = dma.done.wait (!%p1429_p3), %s1122_s26, 4096  }
 0x15b   : > { %1602 = vsyncadd (!%p1429_p3), %s1122_s26, 4294963200  ;;  %s17_s20 = sadd.s32 1, %s1625_s20   ;;  %s1971_s15 = smov %s1609_s16 }
 0x15c   : > { %p14_p5 = scmp.ge.s32.totalorder %s17_s20, 4   ;;  %s1972_s16 = smov %s1613_s17 }
 0x15d   : > { %s1973_s17 = smov %s1708_s28  ;;  %s1974_s18 = smov %s1621_s19 }
 0x15e   : > { %s1975_s19 = smov %s1977_s23  ;;  %16 = sbr.rel (!%p14_p5) target bundleno = 4 (0x4), region = 88 }
 0x165   :  { %1127 = vsyncpa [#allocation4], 1 }
 0x166   :  { %1129 = vsyncpa [#allocation4 + $0x1], 1 }

</bundles_post_ra>
